<compile_context>
chip_gen: v7x
topology: tpu7x:2x2x1
jax: 0.10.0
libtpu: 0.0.40
codegen_flags: <defaults>
</compile_context>

<pallas_src>
import jax
import jax.numpy as jnp
from jax.experimental import pallas as pl
from jax.experimental.pallas import tpu as pltpu

HIDDEN = 32            # stand-in for bert hidden_size (768 in the real model)
NUM_DUR = 11           # num_duration_classes
NUM_REL = 4            # num_relation_output
VOCAB = 128            # synthetic vocab for the embedding-lookup BERT stand-in

HEAD_PAD = 128         # lane-dense padded width of the fused head weight
REL_COL = 16           # column offset of the relation logits inside the fused head


def _round_up(x, m):
    return ((x + m - 1) // m) * m


def _make_kernel(TB, LCHUNK, H_pad, L_true, need_l_mask):
    f32, bf16 = jnp.float32, jnp.bfloat16

    def kernel(hs_ref,    # [TB, LCHUNK, H_pad] bf16 hidden-state chunk
               m_ref,     # [TB, LCHUNK, 2]     bf16 merged span/root masks
               w_ref,     # [5, H_pad, H_pad]   bf16 attn_wp|attn_ws|dur_w1|rel_w1a|rel_w1b
               hw_ref,    # [H_pad, 128]        bf16 fused head weight (dur2 | rel2)
               b_ref,     # [4, H_pad]          f32  attn_b|dur_b1|rel_b1|head_b
               out_ref,   # [3, TB, 128]        f32  dur1 | dur2 | sigmoid(rel) blocks
               sum_acc,   # [TB, H_pad]         f32  running sum (avg pool)
               max_acc):  # [2, TB, H_pad]      f32  running masked maxes
        l = pl.program_id(1)

        @pl.when(l == 0)
        def _init():
            sum_acc[...] = jnp.zeros(sum_acc.shape, sum_acc.dtype)
            max_acc[...] = jnp.full(max_acc.shape, -jnp.inf, max_acc.dtype)

        # --- streamed pooling over the L chunk (bf16 DMA, f32 math) ---
        hs = hs_ref[...].astype(f32)            # [TB, LC, Hp]
        m = m_ref[...].astype(f32)              # [TB, LC, 2]
        # PyTorch reference multiplies by the 0/1 mask then max-pools; masked
        # positions therefore contribute 0 (kept intentionally identical).
        p1 = hs * m[:, :, 0:1]
        p2 = hs * m[:, :, 1:2]
        if need_l_mask:                         # static: only when L was padded up
            pos = l * LCHUNK + jax.lax.broadcasted_iota(jnp.int32, (1, LCHUNK, 1), 1)
            valid = pos < L_true
            p1 = jnp.where(valid, p1, -jnp.inf)
            p2 = jnp.where(valid, p2, -jnp.inf)

        sum_acc[...] = sum_acc[...] + jnp.sum(hs, axis=1)
        max_acc[0] = jnp.maximum(max_acc[0], jnp.max(p1, axis=1))
        max_acc[1] = jnp.maximum(max_acc[1], jnp.max(p2, axis=1))

        # --- heads on the last L chunk only ---
        @pl.when(l == pl.num_programs(1) - 1)
        def _heads():
            seq_pooled = (sum_acc[...] * (1.0 / L_true)).astype(bf16)     # [TB, Hp]
            pools = max_acc[...].reshape(2 * TB, H_pad).astype(bf16)      # [2TB, Hp]

            # attn_layer(cat(pred_pooled, seq_pooled)) split into two matmuls;
            # the seq half + bias is shared between both streams -> computed once.
            shared = (jnp.dot(seq_pooled, w_ref[1], preferred_element_type=f32)
                      + b_ref[0:1])                                       # [TB, Hp]
            c = jnp.dot(pools, w_ref[0], preferred_element_type=f32)      # [2TB, Hp]
            c = (c.reshape(2, TB, H_pad) + shared[None]).reshape(2 * TB, H_pad)
            c_bf = c.astype(bf16)                                         # cast once, reused

            # duration_mlp first linear on both streams (Dropout = identity in eval)
            h_stack = (jnp.dot(c_bf, w_ref[2], preferred_element_type=f32)
                       + b_ref[1:2])                                      # [2TB, Hp]
            # relation_mlp first linear on cat(c1, c2), split by input halves
            rh = (jnp.dot(c_bf[:TB], w_ref[3], preferred_element_type=f32)
                  + jnp.dot(c_bf[TB:], w_ref[4], preferred_element_type=f32)
                  + b_ref[2:3])                                           # [TB, Hp]

            # fused lane-padded head: dur_w2 in cols [0,11), rel_w2 in cols [16,20)
            act = jnp.concatenate([h_stack, rh], axis=0).astype(bf16)     # [3TB, Hp]
            head = (jnp.dot(act, hw_ref[...], preferred_element_type=f32)
                    + b_ref[3:4, :HEAD_PAD])                              # [3TB, 128]

            out_ref[0] = head[:TB]                       # dur1 logits (cols [0,11))
            out_ref[1] = head[TB:2 * TB]                 # dur2 logits (cols [0,11))
            out_ref[2] = jax.nn.sigmoid(head[2 * TB:])   # rel probs (cols [16,20))

    return kernel


def multitask_heads_pallas(hidden_states, mask1, mask2, params,
                           vmem_budget_bytes=24 * 1024 * 1024):
    """Pooling + MLP-head portion of the forward in one Pallas kernel.

    hidden_states: [B, L, H] (any float dtype)
    mask1, mask2:  [B, L]
    Returns (dur1 [B,11], dur2 [B,11], rel [B,4]) in float32.
    """
    B, L, H = hidden_states.shape
    f32, bf16 = jnp.float32, jnp.bfloat16

    H_pad = _round_up(H, 128)                      # lane-dense hidden dim

    # L chunking: either a single full-L block, or 128-position chunks.
    LCHUNK = _round_up(L, 8) if L <= 256 else 128
    L_pad = _round_up(L, LCHUNK)
    nl = L_pad // LCHUNK

    # Batch tile sized against a ~24 MiB VMEM budget: double-buffered bf16 input
    # blocks + ~3 chunk-sized f32 pooling temporaries + accumulators.
    per_row = (2 * LCHUNK * H_pad * 2              # hs block, 2 buffers, bf16
               + 2 * LCHUNK * 128 * 2              # merged mask block (lane-padded), bf16
               + 3 * LCHUNK * H_pad * 4            # f32 pooling temporaries
               + 3 * H_pad * 4)                    # pooling accumulators
    TB = max(8, min(256, (vmem_budget_bytes // per_row) // 8 * 8))
    B_pad = _round_up(B, 8)
    TB = min(TB, B_pad)
    B_pad = _round_up(B, TB)
    nb = B_pad // TB
    # keep both v7x TensorCores busy when the whole padded batch fits one tile
    if nb == 1 and TB >= 16:
        TB = _round_up(TB // 2, 8)
        B_pad = _round_up(B, TB)
        nb = B_pad // TB

    pad_b_rows, pad_l, pad_h = B_pad - B, L_pad - L, H_pad - H

    # hidden states DMA'd as bf16 (pooling math upcast to f32 in the kernel)
    hs = hidden_states.astype(bf16)
    if pad_b_rows or pad_l or pad_h:
        hs = jnp.pad(hs, ((0, pad_b_rows), (0, pad_l), (0, pad_h)))

    # the two masks merged into one [B, L, 2] bf16 input (one DMA, half the
    # lane-padded VMEM of two separate [B, L, 1] blocks)
    masks = jnp.stack([mask1.astype(bf16), mask2.astype(bf16)], axis=-1)
    if pad_b_rows or pad_l:
        masks = jnp.pad(masks, ((0, pad_b_rows), (0, pad_l), (0, 0)))

    # ---- pack the small weights/biases into 3 lane-padded inputs ----
    def pad_w(w):
        return jnp.pad(w.astype(f32), ((0, pad_h), (0, pad_h)))

    def pad_bvec(b):
        return jnp.pad(b.reshape(-1).astype(f32), (0, pad_h))

    w_stack = jnp.stack([pad_w(params["attn_wp"]), pad_w(params["attn_ws"]),
                         pad_w(params["dur_w1"]), pad_w(params["rel_w1a"]),
                         pad_w(params["rel_w1b"])], axis=0).astype(bf16)   # [5,Hp,Hp]

    head_w = jnp.zeros((H_pad, HEAD_PAD), f32)
    head_w = head_w.at[:H, :NUM_DUR].set(params["dur_w2"])
    head_w = head_w.at[:H, REL_COL:REL_COL + NUM_REL].set(params["rel_w2"])
    head_w = head_w.astype(bf16)                                           # [Hp,128]

    head_b_row = jnp.zeros((H_pad,), f32)
    head_b_row = head_b_row.at[:NUM_DUR].set(params["dur_b2"].reshape(-1))
    head_b_row = head_b_row.at[REL_COL:REL_COL + NUM_REL].set(params["rel_b2"].reshape(-1))
    b_stack = jnp.stack([pad_bvec(params["attn_b"]), pad_bvec(params["dur_b1"]),
                         pad_bvec(params["rel_b1"]), head_b_row], axis=0)  # [4,Hp] f32

    kernel = _make_kernel(TB, LCHUNK, H_pad, L, L_pad != L)

    out = pl.pallas_call(
        kernel,
        out_shape=jax.ShapeDtypeStruct((3, B_pad, HEAD_PAD), f32),
        grid=(nb, nl),
        in_specs=[
            pl.BlockSpec((TB, LCHUNK, H_pad), lambda i, l: (i, l, 0)),   # hidden states
            pl.BlockSpec((TB, LCHUNK, 2), lambda i, l: (i, l, 0)),       # merged masks
            pl.BlockSpec((5, H_pad, H_pad), lambda i, l: (0, 0, 0)),     # [H,H] weights
            pl.BlockSpec((H_pad, HEAD_PAD), lambda i, l: (0, 0)),        # fused head weight
            pl.BlockSpec((4, H_pad), lambda i, l: (0, 0)),               # fused biases
        ],
        out_specs=pl.BlockSpec((3, TB, HEAD_PAD), lambda i, l: (0, i, 0)),
        scratch_shapes=[
            pltpu.VMEM((TB, H_pad), jnp.float32),       # avg-pool running sum
            pltpu.VMEM((2, TB, H_pad), jnp.float32),    # masked-max running maxes
        ],
        compiler_params=pltpu.CompilerParams(
            dimension_semantics=("parallel", "arbitrary"),
            vmem_limit_bytes=48 * 1024 * 1024),
    )(hs, masks, w_stack, head_w, b_stack)

    dur1 = out[0, :B, :NUM_DUR]
    dur2 = out[1, :B, :NUM_DUR]
    rel = out[2, :B, REL_COL:REL_COL + NUM_REL]
    return dur1, dur2, rel


def init_params(key):
    """Deterministic synthetic parameters (shapes follow the module __init__,
    with HIDDEN standing in for bert hidden_size).  Linear weights are stored
    pre-transposed as [in_features, out_features]."""
    ks = jax.random.split(key, 10)
    s = 0.05
    return {
        # stand-in "BERT": embedding table
        "embed": jax.random.normal(ks[0], (VOCAB, HIDDEN), jnp.float32),
        # attn_layer: Linear(2H, H), split into pred half / seq half
        "attn_wp": s * jax.random.normal(ks[1], (HIDDEN, HIDDEN), jnp.float32),
        "attn_ws": s * jax.random.normal(ks[2], (HIDDEN, HIDDEN), jnp.float32),
        "attn_b": s * jax.random.normal(ks[3], (1, HIDDEN), jnp.float32),
        # duration_mlp: Linear(H, H), Linear(H, NUM_DUR)
        "dur_w1": s * jax.random.normal(ks[4], (HIDDEN, HIDDEN), jnp.float32),
        "dur_b1": s * jax.random.normal(ks[5], (1, HIDDEN), jnp.float32),
        "dur_w2": s * jax.random.normal(ks[6], (HIDDEN, NUM_DUR), jnp.float32),
        "dur_b2": jnp.zeros((1, NUM_DUR), jnp.float32),
        # relation_mlp: Linear(2H, H) split, Linear(H, NUM_REL)
        "rel_w1a": s * jax.random.normal(ks[7], (HIDDEN, HIDDEN), jnp.float32),
        "rel_w1b": s * jax.random.normal(ks[8], (HIDDEN, HIDDEN), jnp.float32),
        "rel_b1": jnp.zeros((1, HIDDEN), jnp.float32),
        "rel_w2": s * jax.random.normal(ks[9], (HIDDEN, NUM_REL), jnp.float32),
        "rel_b2": jnp.zeros((1, NUM_REL), jnp.float32),
    }


def multitask_forward(params, tokens, span1_masks, span2_masks,
                      root1_masks, root2_masks,
                      span_based=True, root_based=False):
    """Mirrors Multitask_Baseline.forward (eval mode)."""
    # TODO(synk): real BertModel forward not translatable here; hidden states
    # come from a deterministic embedding lookup (plain-JAX glue).
    hidden_states = params["embed"][tokens].astype(jnp.float32)   # [B, L, H]

    if root_based:
        m1, m2 = root1_masks, root2_masks
    elif span_based:
        m1, m2 = span1_masks, span2_masks
    else:
        raise ValueError("either span_based or root_based must be True")

    return multitask_heads_pallas(
        hidden_states, m1.astype(jnp.float32), m2.astype(jnp.float32), params)


def _reference_heads(params, hidden_states, m1, m2):
    """Pure-JAX f32 reference of the pooling + heads (for a tolerance check)."""
    hs = hidden_states.astype(jnp.float32)
    seq = jnp.mean(hs, axis=1)
    p1 = jnp.max(hs * m1[:, :, None], axis=1)
    p2 = jnp.max(hs * m2[:, :, None], axis=1)
    c1 = p1 @ params["attn_wp"] + seq @ params["attn_ws"] + params["attn_b"]
    c2 = p2 @ params["attn_wp"] + seq @ params["attn_ws"] + params["attn_b"]
    d1 = (c1 @ params["dur_w1"] + params["dur_b1"]) @ params["dur_w2"] + params["dur_b2"]
    d2 = (c2 @ params["dur_w1"] + params["dur_b1"]) @ params["dur_w2"] + params["dur_b2"]
    rh = c1 @ params["rel_w1a"] + c2 @ params["rel_w1b"] + params["rel_b1"]
    rel = jax.nn.sigmoid(rh @ params["rel_w2"] + params["rel_b2"])
    return d1, d2, rel


if __name__ == "__main__":
    key = jax.random.PRNGKey(0)
    k_tok, k_m1, k_m2, k_par = jax.random.split(key, 4)

    B, L = 2, 8
    tokens = jax.random.randint(k_tok, (B, L), 0, VOCAB)
    span1_masks = (jax.random.uniform(k_m1, (B, L)) > 0.5).astype(jnp.float32)
    span2_masks = (jax.random.uniform(k_m2, (B, L)) > 0.5).astype(jnp.float32)
    root1_masks = jnp.zeros((B, L), jnp.float32)
    root2_masks = jnp.zeros((B, L), jnp.float32)

    params = init_params(k_par)

    dur1, dur2, rel = multitask_forward(
        params, tokens, span1_masks, span2_masks, root1_masks, root2_masks)
    jax.block_until_ready((dur1, dur2, rel))

    assert dur1.shape == (B, NUM_DUR)
    assert dur2.shape == (B, NUM_DUR)
    assert rel.shape == (B, NUM_REL)
    assert bool(jnp.all(jnp.isfinite(dur1)))
    assert bool(jnp.all(jnp.isfinite(dur2)))
    assert bool(jnp.all((rel >= 0.0) & (rel <= 1.0)))

    # loose tolerance check vs a pure-JAX f32 reference (bf16 matmul/DMA drift)
    hs_ref = params["embed"][tokens].astype(jnp.float32)
    r1, r2, rr = _reference_heads(params, hs_ref, span1_masks, span2_masks)
    assert bool(jnp.max(jnp.abs(dur1 - r1)) < 5e-2)
    assert bool(jnp.max(jnp.abs(dur2 - r2)) < 5e-2)
    assert bool(jnp.max(jnp.abs(rel - rr)) < 5e-2)

    print("KERNEL_OK")
</pallas_src>

<mosaic_0001>
module attributes {stable_mosaic.version = 11 : i64} {
  func.func @kernel(%arg0: i32, %arg1: i32, %arg2: memref<8x8x128xbf16, #tpu.memory_space<vmem>>, %arg3: memref<8x8x2xbf16, #tpu.memory_space<vmem>>, %arg4: memref<5x128x128xbf16, #tpu.memory_space<vmem>>, %arg5: memref<128x128xbf16, #tpu.memory_space<vmem>>, %arg6: memref<4x128xf32, #tpu.memory_space<vmem>>, %arg7: memref<3x8x128xf32, #tpu.memory_space<vmem>>, %arg8: memref<8x128xf32, #tpu.memory_space<vmem>>, %arg9: memref<2x8x128xf32, #tpu.memory_space<vmem>>) attributes {dimension_semantics = [#tpu.dimension_semantics<parallel>, #tpu.dimension_semantics<arbitrary>], iteration_bounds = array<i64: 1, 1>, scalar_prefetch = 0 : i64, scratch_operands = 2 : i64, tpu.core_type = #tpu.core_type<tc>, window_params = [{transform_indices = @transform_0, window_bounds = array<i64: 8, 8, 128>}, {transform_indices = @transform_1, window_bounds = array<i64: 8, 8, 2>}, {pipeline_mode = #tpu.pipeline_mode<synchronous>, transform_indices = @transform_2, window_bounds = array<i64: 5, 128, 128>}, {pipeline_mode = #tpu.pipeline_mode<synchronous>, transform_indices = @transform_3, window_bounds = array<i64: 128, 128>}, {pipeline_mode = #tpu.pipeline_mode<synchronous>, transform_indices = @transform_4, window_bounds = array<i64: 4, 128>}, {transform_indices = @transform_5, window_bounds = array<i64: 3, 8, 128>}]} {
    %c0_i32 = arith.constant 0 : i32
    %0 = arith.cmpi eq, %arg1, %c0_i32 : i32
    %1 = arith.extui %0 : i1 to i32
    %c0_i32_0 = arith.constant 0 : i32
    %2 = arith.cmpi ne, %1, %c0_i32_0 : i32
    scf.if %2 {
      %cst_25 = arith.constant 0.000000e+00 : f32
      %34 = vector.broadcast %cst_25 : f32 to vector<8x128xf32>
      %c0_26 = arith.constant 0 : index
      %c0_27 = arith.constant 0 : index
      %35 = vector.load %arg8[%c0_26, %c0_27] : memref<8x128xf32, #tpu.memory_space<vmem>>, vector<8x128xf32>
      tpu.vector_store %arg8[%c0_26, %c0_27], %34 {strides = array<i32>} : memref<8x128xf32, #tpu.memory_space<vmem>>, vector<8x128xf32>,
      %cst_28 = arith.constant 0xFF800000 : f32
      %36 = vector.broadcast %cst_28 : f32 to vector<2x8x128xf32>
      %c0_29 = arith.constant 0 : index
      %c0_30 = arith.constant 0 : index
      %c0_31 = arith.constant 0 : index
      %37 = vector.load %arg9[%c0_29, %c0_30, %c0_31] : memref<2x8x128xf32, #tpu.memory_space<vmem>>, vector<2x8x128xf32>
      tpu.vector_store %arg9[%c0_29, %c0_30, %c0_31], %36 {strides = array<i32>} : memref<2x8x128xf32, #tpu.memory_space<vmem>>, vector<2x8x128xf32>,
    } else {
    }
    %c0 = arith.constant 0 : index
    %c0_1 = arith.constant 0 : index
    %c0_2 = arith.constant 0 : index
    %3 = vector.load %arg2[%c0, %c0_1, %c0_2] : memref<8x8x128xbf16, #tpu.memory_space<vmem>>, vector<8x8x128xbf16>
    %4 = arith.extf %3 : vector<8x8x128xbf16> to vector<8x8x128xf32>
    %c0_3 = arith.constant 0 : index
    %c0_4 = arith.constant 0 : index
    %c0_5 = arith.constant 0 : index
    %5 = vector.load %arg3[%c0_3, %c0_4, %c0_5] : memref<8x8x2xbf16, #tpu.memory_space<vmem>>, vector<8x8x2xbf16>
    %6 = arith.extf %5 : vector<8x8x2xbf16> to vector<8x8x2xf32>
    %7 = vector.extract_strided_slice %6 {offsets = [0, 0, 0], sizes = [8, 8, 1], strides = [1, 1, 1]} : vector<8x8x2xf32> to vector<8x8x1xf32>
    %8 = vector.broadcast %7 : vector<8x8x1xf32> to vector<8x8x128xf32>
    %9 = arith.mulf %4, %8 : vector<8x8x128xf32>
    %10 = vector.extract_strided_slice %6 {offsets = [0, 0, 1], sizes = [8, 8, 1], strides = [1, 1, 1]} : vector<8x8x2xf32> to vector<8x8x1xf32>
    %11 = vector.broadcast %10 : vector<8x8x1xf32> to vector<8x8x128xf32>
    %12 = arith.mulf %4, %11 : vector<8x8x128xf32>
    %c0_6 = arith.constant 0 : index
    %c0_7 = arith.constant 0 : index
    %13 = vector.load %arg8[%c0_6, %c0_7] : memref<8x128xf32, #tpu.memory_space<vmem>>, vector<8x128xf32>
    %cst = arith.constant dense<0.000000e+00> : vector<8x128xf32>
    %14 = vector.multi_reduction <add>, %4, %cst [1] : vector<8x8x128xf32> to vector<8x128xf32>
    %15 = arith.addf %13, %14 : vector<8x128xf32>
    %c0_8 = arith.constant 0 : index
    %c0_9 = arith.constant 0 : index
    %16 = vector.load %arg8[%c0_8, %c0_9] : memref<8x128xf32, #tpu.memory_space<vmem>>, vector<8x128xf32>
    tpu.vector_store %arg8[%c0_8, %c0_9], %15 {strides = array<i32>} : memref<8x128xf32, #tpu.memory_space<vmem>>, vector<8x128xf32>,
    %c0_10 = arith.constant 0 : index
    %c0_11 = arith.constant 0 : index
    %c0_12 = arith.constant 0 : index
    %17 = vector.load %arg9[%c0_10, %c0_11, %c0_12] : memref<2x8x128xf32, #tpu.memory_space<vmem>>, vector<1x8x128xf32>
    %18 = vector.shape_cast %17 : vector<1x8x128xf32> to vector<8x128xf32>
    %cst_13 = arith.constant dense<0xFF800000> : vector<8x128xf32>
    %19 = vector.multi_reduction <maximumf>, %9, %cst_13 [1] : vector<8x8x128xf32> to vector<8x128xf32>
    %20 = arith.maximumf %18, %19 : vector<8x128xf32>
    %c0_14 = arith.constant 0 : index
    %c0_15 = arith.constant 0 : index
    %c0_16 = arith.constant 0 : index
    %21 = vector.load %arg9[%c0_14, %c0_15, %c0_16] : memref<2x8x128xf32, #tpu.memory_space<vmem>>, vector<1x8x128xf32>
    %22 = vector.shape_cast %21 : vector<1x8x128xf32> to vector<8x128xf32>
    %23 = vector.shape_cast %20 : vector<8x128xf32> to vector<1x8x128xf32>
    tpu.vector_store %arg9[%c0_14, %c0_15, %c0_16], %23 {strides = array<i32>} : memref<2x8x128xf32, #tpu.memory_space<vmem>>, vector<1x8x128xf32>,
    %c1 = arith.constant 1 : index
    %c0_17 = arith.constant 0 : index
    %c0_18 = arith.constant 0 : index
    %24 = vector.load %arg9[%c1, %c0_17, %c0_18] : memref<2x8x128xf32, #tpu.memory_space<vmem>>, vector<1x8x128xf32>
    %25 = vector.shape_cast %24 : vector<1x8x128xf32> to vector<8x128xf32>
    %cst_19 = arith.constant dense<0xFF800000> : vector<8x128xf32>
    %26 = vector.multi_reduction <maximumf>, %12, %cst_19 [1] : vector<8x8x128xf32> to vector<8x128xf32>
    %27 = arith.maximumf %25, %26 : vector<8x128xf32>
    %c1_20 = arith.constant 1 : index
    %c0_21 = arith.constant 0 : index
    %c0_22 = arith.constant 0 : index
    %28 = vector.load %arg9[%c1_20, %c0_21, %c0_22] : memref<2x8x128xf32, #tpu.memory_space<vmem>>, vector<1x8x128xf32>
    %29 = vector.shape_cast %28 : vector<1x8x128xf32> to vector<8x128xf32>
    %30 = vector.shape_cast %27 : vector<8x128xf32> to vector<1x8x128xf32>
    tpu.vector_store %arg9[%c1_20, %c0_21, %c0_22], %30 {strides = array<i32>} : memref<2x8x128xf32, #tpu.memory_space<vmem>>, vector<1x8x128xf32>,
    %c0_i32_23 = arith.constant 0 : i32
    %31 = arith.cmpi eq, %arg1, %c0_i32_23 : i32
    %32 = arith.extui %31 : i1 to i32
    %c0_i32_24 = arith.constant 0 : i32
    %33 = arith.cmpi ne, %32, %c0_i32_24 : i32
    scf.if %33 {
      %c0_25 = arith.constant 0 : index
      %c0_26 = arith.constant 0 : index
      %34 = vector.load %arg8[%c0_25, %c0_26] : memref<8x128xf32, #tpu.memory_space<vmem>>, vector<8x128xf32>
      %cst_27 = arith.constant 1.250000e-01 : f32
      %35 = vector.broadcast %cst_27 : f32 to vector<8x128xf32>
      %36 = arith.mulf %34, %35 : vector<8x128xf32>
      %37 = arith.truncf %36 : vector<8x128xf32> to vector<8x128xbf16>
      %c0_28 = arith.constant 0 : index
      %c0_29 = arith.constant 0 : index
      %c0_30 = arith.constant 0 : index
      %38 = vector.load %arg9[%c0_28, %c0_29, %c0_30] : memref<2x8x128xf32, #tpu.memory_space<vmem>>, vector<2x8x128xf32>
      %39 = vector.shape_cast %38 : vector<2x8x128xf32> to vector<16x128xf32>
      %40 = arith.truncf %39 : vector<16x128xf32> to vector<16x128xbf16>
      %c1_31 = arith.constant 1 : index
      %c0_32 = arith.constant 0 : index
      %c0_33 = arith.constant 0 : index
      %41 = vector.load %arg4[%c1_31, %c0_32, %c0_33] : memref<5x128x128xbf16, #tpu.memory_space<vmem>>, vector<1x128x128xbf16>
      %42 = vector.shape_cast %41 : vector<1x128x128xbf16> to vector<128x128xbf16>
      %cst_34 = arith.constant dense<0.000000e+00> : vector<8x128xf32>
      %43 = tpu.matmul %37, %42, %cst_34 {dimension_numbers = #tpu.dot_dimension_numbers<[1], [0], [0], [1], [0, 0, 1, 1], [], []>} : vector<8x128xbf16>, vector<128x128xbf16>, vector<8x128xf32> -> vector<8x128xf32>
      %c0_35 = arith.constant 0 : index
      %c0_36 = arith.constant 0 : index
      %44 = vector.load %arg6[%c0_35, %c0_36] : memref<4x128xf32, #tpu.memory_space<vmem>>, vector<1x128xf32>
      %45 = vector.broadcast %44 : vector<1x128xf32> to vector<8x128xf32>
      %46 = arith.addf %43, %45 : vector<8x128xf32>
      %c0_37 = arith.constant 0 : index
      %c0_38 = arith.constant 0 : index
      %c0_39 = arith.constant 0 : index
      %47 = vector.load %arg4[%c0_37, %c0_38, %c0_39] : memref<5x128x128xbf16, #tpu.memory_space<vmem>>, vector<1x128x128xbf16>
      %48 = vector.shape_cast %47 : vector<1x128x128xbf16> to vector<128x128xbf16>
      %cst_40 = arith.constant dense<0.000000e+00> : vector<16x128xf32>
      %49 = tpu.matmul %40, %48, %cst_40 {dimension_numbers = #tpu.dot_dimension_numbers<[1], [0], [0], [1], [0, 0, 1, 1], [], []>} : vector<16x128xbf16>, vector<128x128xbf16>, vector<16x128xf32> -> vector<16x128xf32>
      %50 = vector.shape_cast %49 : vector<16x128xf32> to vector<2x8x128xf32>
      %51 = vector.shape_cast %46 : vector<8x128xf32> to vector<1x8x128xf32>
      %52 = vector.broadcast %51 : vector<1x8x128xf32> to vector<2x8x128xf32>
      %53 = arith.addf %50, %52 : vector<2x8x128xf32>
      %54 = vector.shape_cast %53 : vector<2x8x128xf32> to vector<16x128xf32>
      %55 = arith.truncf %54 : vector<16x128xf32> to vector<16x128xbf16>
      %c2 = arith.constant 2 : index
      %c0_41 = arith.constant 0 : index
      %c0_42 = arith.constant 0 : index
      %56 = vector.load %arg4[%c2, %c0_41, %c0_42] : memref<5x128x128xbf16, #tpu.memory_space<vmem>>, vector<1x128x128xbf16>
      %57 = vector.shape_cast %56 : vector<1x128x128xbf16> to vector<128x128xbf16>
      %cst_43 = arith.constant dense<0.000000e+00> : vector<16x128xf32>
      %58 = tpu.matmul %55, %57, %cst_43 {dimension_numbers = #tpu.dot_dimension_numbers<[1], [0], [0], [1], [0, 0, 1, 1], [], []>} : vector<16x128xbf16>, vector<128x128xbf16>, vector<16x128xf32> -> vector<16x128xf32>
      %c1_44 = arith.constant 1 : index
      %c0_45 = arith.constant 0 : index
      %59 = vector.load %arg6[%c1_44, %c0_45] : memref<4x128xf32, #tpu.memory_space<vmem>>, vector<1x128xf32>
      %60 = vector.broadcast %59 : vector<1x128xf32> to vector<16x128xf32>
      %61 = arith.addf %58, %60 : vector<16x128xf32>
      %62 = vector.extract_strided_slice %55 {offsets = [0, 0], sizes = [8, 128], strides = [1, 1]} : vector<16x128xbf16> to vector<8x128xbf16>
      %c3 = arith.constant 3 : index
      %c0_46 = arith.constant 0 : index
      %c0_47 = arith.constant 0 : index
      %63 = vector.load %arg4[%c3, %c0_46, %c0_47] : memref<5x128x128xbf16, #tpu.memory_space<vmem>>, vector<1x128x128xbf16>
      %64 = vector.shape_cast %63 : vector<1x128x128xbf16> to vector<128x128xbf16>
      %cst_48 = arith.constant dense<0.000000e+00> : vector<8x128xf32>
      %65 = tpu.matmul %62, %64, %cst_48 {dimension_numbers = #tpu.dot_dimension_numbers<[1], [0], [0], [1], [0, 0, 1, 1], [], []>} : vector<8x128xbf16>, vector<128x128xbf16>, vector<8x128xf32> -> vector<8x128xf32>
      %66 = vector.extract_strided_slice %55 {offsets = [8, 0], sizes = [8, 128], strides = [1, 1]} : vector<16x128xbf16> to vector<8x128xbf16>
      %c4 = arith.constant 4 : index
      %c0_49 = arith.constant 0 : index
      %c0_50 = arith.constant 0 : index
      %67 = vector.load %arg4[%c4, %c0_49, %c0_50] : memref<5x128x128xbf16, #tpu.memory_space<vmem>>, vector<1x128x128xbf16>
      %68 = vector.shape_cast %67 : vector<1x128x128xbf16> to vector<128x128xbf16>
      %cst_51 = arith.constant dense<0.000000e+00> : vector<8x128xf32>
      %69 = tpu.matmul %66, %68, %cst_51 {dimension_numbers = #tpu.dot_dimension_numbers<[1], [0], [0], [1], [0, 0, 1, 1], [], []>} : vector<8x128xbf16>, vector<128x128xbf16>, vector<8x128xf32> -> vector<8x128xf32>
      %70 = arith.addf %65, %69 : vector<8x128xf32>
      %c2_52 = arith.constant 2 : index
      %c0_53 = arith.constant 0 : index
      %71 = vector.load %arg6[%c2_52, %c0_53] : memref<4x128xf32, #tpu.memory_space<vmem>>, vector<1x128xf32>
      %72 = vector.broadcast %71 : vector<1x128xf32> to vector<8x128xf32>
      %73 = arith.addf %70, %72 : vector<8x128xf32>
      %74 = tpu.concatenate %61, %73 in 0 : vector<16x128xf32>, vector<8x128xf32> -> vector<24x128xf32>
      %75 = arith.truncf %74 : vector<24x128xf32> to vector<24x128xbf16>
      %c0_54 = arith.constant 0 : index
      %c0_55 = arith.constant 0 : index
      %76 = vector.load %arg5[%c0_54, %c0_55] : memref<128x128xbf16, #tpu.memory_space<vmem>>, vector<128x128xbf16>
      %cst_56 = arith.constant dense<0.000000e+00> : vector<24x128xf32>
      %77 = tpu.matmul %75, %76, %cst_56 {dimension_numbers = #tpu.dot_dimension_numbers<[1], [0], [0], [1], [0, 0, 1, 1], [], []>} : vector<24x128xbf16>, vector<128x128xbf16>, vector<24x128xf32> -> vector<24x128xf32>
      %c3_57 = arith.constant 3 : index
      %c0_58 = arith.constant 0 : index
      %78 = vector.load %arg6[%c3_57, %c0_58] : memref<4x128xf32, #tpu.memory_space<vmem>>, vector<1x128xf32>
      %79 = vector.broadcast %78 : vector<1x128xf32> to vector<24x128xf32>
      %80 = arith.addf %77, %79 : vector<24x128xf32>
      %81 = vector.extract_strided_slice %80 {offsets = [0, 0], sizes = [8, 128], strides = [1, 1]} : vector<24x128xf32> to vector<8x128xf32>
      %c0_59 = arith.constant 0 : index
      %c0_60 = arith.constant 0 : index
      %c0_61 = arith.constant 0 : index
      %82 = vector.load %arg7[%c0_59, %c0_60, %c0_61] : memref<3x8x128xf32, #tpu.memory_space<vmem>>, vector<1x8x128xf32>
      %83 = vector.shape_cast %82 : vector<1x8x128xf32> to vector<8x128xf32>
      %84 = vector.shape_cast %81 : vector<8x128xf32> to vector<1x8x128xf32>
      tpu.vector_store %arg7[%c0_59, %c0_60, %c0_61], %84 {strides = array<i32>} : memref<3x8x128xf32, #tpu.memory_space<vmem>>, vector<1x8x128xf32>,
      %85 = vector.extract_strided_slice %80 {offsets = [8, 0], sizes = [8, 128], strides = [1, 1]} : vector<24x128xf32> to vector<8x128xf32>
      %c1_62 = arith.constant 1 : index
      %c0_63 = arith.constant 0 : index
      %c0_64 = arith.constant 0 : index
      %86 = vector.load %arg7[%c1_62, %c0_63, %c0_64] : memref<3x8x128xf32, #tpu.memory_space<vmem>>, vector<1x8x128xf32>
      %87 = vector.shape_cast %86 : vector<1x8x128xf32> to vector<8x128xf32>
      %88 = vector.shape_cast %85 : vector<8x128xf32> to vector<1x8x128xf32>
      tpu.vector_store %arg7[%c1_62, %c0_63, %c0_64], %88 {strides = array<i32>} : memref<3x8x128xf32, #tpu.memory_space<vmem>>, vector<1x8x128xf32>,
      %89 = vector.extract_strided_slice %80 {offsets = [16, 0], sizes = [8, 128], strides = [1, 1]} : vector<24x128xf32> to vector<8x128xf32>
      %90 = arith.negf %89 : vector<8x128xf32>
      %91 = math.exp %90 : vector<8x128xf32>
      %cst_65 = arith.constant 1.000000e+00 : f32
      %92 = vector.broadcast %cst_65 : f32 to vector<8x128xf32>
      %93 = arith.addf %92, %91 : vector<8x128xf32>
      %94 = arith.divf %92, %93 : vector<8x128xf32>
      %c2_66 = arith.constant 2 : index
      %c0_67 = arith.constant 0 : index
      %c0_68 = arith.constant 0 : index
      %95 = vector.load %arg7[%c2_66, %c0_67, %c0_68] : memref<3x8x128xf32, #tpu.memory_space<vmem>>, vector<1x8x128xf32>
      %96 = vector.shape_cast %95 : vector<1x8x128xf32> to vector<8x128xf32>
      %97 = vector.shape_cast %94 : vector<8x128xf32> to vector<1x8x128xf32>
      tpu.vector_store %arg7[%c2_66, %c0_67, %c0_68], %97 {strides = array<i32>} : memref<3x8x128xf32, #tpu.memory_space<vmem>>, vector<1x8x128xf32>,
    } else {
    }
    return
  }
  func.func @transform_0(%arg0: i32, %arg1: i32) -> (i32, i32, i32) {
    %c0_i32 = arith.constant 0 : i32
    %c0_i32_0 = arith.constant 0 : i32
    return %arg0, %arg1, %c0_i32 : i32, i32, i32
  }
  func.func @transform_1(%arg0: i32, %arg1: i32) -> (i32, i32, i32) {
    %c0_i32 = arith.constant 0 : i32
    %c0_i32_0 = arith.constant 0 : i32
    return %arg0, %arg1, %c0_i32 : i32, i32, i32
  }
  func.func @transform_2(%arg0: i32, %arg1: i32) -> (i32, i32, i32) {
    %c0_i32 = arith.constant 0 : i32
    %c0_i32_0 = arith.constant 0 : i32
    %c0_i32_1 = arith.constant 0 : i32
    %c0_i32_2 = arith.constant 0 : i32
    return %c0_i32, %c0_i32_0, %c0_i32_1 : i32, i32, i32
  }
  func.func @transform_3(%arg0: i32, %arg1: i32) -> (i32, i32) {
    %c0_i32 = arith.constant 0 : i32
    %c0_i32_0 = arith.constant 0 : i32
    %c0_i32_1 = arith.constant 0 : i32
    return %c0_i32, %c0_i32_0 : i32, i32
  }
  func.func @transform_4(%arg0: i32, %arg1: i32) -> (i32, i32) {
    %c0_i32 = arith.constant 0 : i32
    %c0_i32_0 = arith.constant 0 : i32
    %c0_i32_1 = arith.constant 0 : i32
    return %c0_i32, %c0_i32_0 : i32, i32
  }
  func.func @transform_5(%arg0: i32, %arg1: i32) -> (i32, i32, i32) {
    %c0_i32 = arith.constant 0 : i32
    %c0_i32_0 = arith.constant 0 : i32
    %c0_i32_1 = arith.constant 0 : i32
    return %c0_i32, %arg0, %c0_i32_0 : i32, i32, i32
  }
}

</mosaic_0001>

<bundles_post_ra>
// kernel: tpu_custom_call.1
= control target key start
LH: loop header
LB: loop body
LE: loop exit
PB: predicated region body
PF: predicated region fallthrough
CT: control target
= control target key end

     0   :  { %10 = vsyncpa [#allocation5], 0  ;;  %s1775_s0 = inlined_call_operand.vmem [shape: bf16[8,8,128], index: 0, kind: input, shape index: {}]   ;;  %s1776_s1 = inlined_call_operand.vmem [shape: bf16[8,8,2], index: 1, kind: input, shape index: {}]   ;;  %s1777_s2 = inlined_call_operand.hbm [shape: bf16[5,128,128], index: 2, kind: input, shape index: {}]   ;;  %s1778_s3 = inlined_call_operand.hbm [shape: bf16[128,128], index: 3, kind: input, shape index: {}]   ;;  %s1779_s4 = inlined_call_operand.vmem [shape: f32[4,128], index: 4, kind: input, shape index: {}]   ;;  %s1780_s5 = inlined_call_operand.hbm [shape: f32[3,8,128], index: 5, kind: output, shape index: {}]  }
   0x1   :  { %11 = vsyncpa [#allocation8], 0 }
   0x2   :  { %12 = vsyncpa [#allocation6], 0  ;;  %s1537_s18 = smov [#allocation4]   ;;  %s1465_s22 = scalar_lea.hbm %s1777_s2, 5120 }
   0x3   :  { %s22_s19 = sshll.u32 %s1537_s18, 4  ;;  %p1466_p0 = scmp.ne.s32.totalorder %s1777_s2, %s1465_s22  ;;  %s23_s19 = int_to_ptr.vmem [resolvable:$true] %s22_s19 }
   0x4   :  { %p1469_p1 = scmp.lt.u32.totalorder %s1465_s22, %s1777_s2 }
   0x6   :  { %p1471_p2 = pnand %p1469_p1, %p1466_p0 }
   0x8   :  { %1474 = shalt.err (!%p1471_p2)
}
   0x9   :  { %s1475_s27 = scalar_lea.vmem %s23_s19, 5120  ;;  %p1480_p4 = scmp.lt.s32.totalorder %s23_s19, %s23_s19 }
   0xa   :  { %p1476_p3 = scmp.ne.s32.totalorder %s23_s19, %s1475_s27  ;;  %p1481_p5 = scmp.lt.s32.totalorder %s1475_s27, %s1475_s27 }
   0xc   :  { %p1482_p6 = por %p1481_p5, %p1480_p4 }
   0xe   :  { %p1483_p7 = pnand %p1482_p6, %p1476_p3 }
  0x10   :  { %1486 = shalt.err (!%p1483_p7)
}
  0x11   :  { %s1538_s28 = smov 64   ;;  %s1539_s29 = smov 4  }
  0x12   :  { %28 = dma.hbm_to_vmem [thread:$0]  %s1777_s2, 5120, %s23_s19, [#allocation5], %s1538_s28, %s1538_s28, %s1539_s29  }
  0x13   :  { %s1540_s7 = smov [#allocation7]   ;;  %s1487_s11 = scalar_lea.hbm %s1778_s3, 1024 }
  0x14   :  { %s34_s8 = sshll.u32 %s1540_s7, 4  ;;  %p1488_p8 = scmp.ne.s32.totalorder %s1778_s3, %s1487_s11  ;;  %s35_s8 = int_to_ptr.vmem [resolvable:$true] %s34_s8 }
  0x15   :  { %p1491_p9 = scmp.lt.u32.totalorder %s1487_s11, %s1778_s3 }
  0x17   :  { %p1493_p10 = pnand %p1491_p9, %p1488_p8 }
  0x19   :  { %1496 = shalt.err (!%p1493_p10)
}
  0x1a   :  { %s1497_s16 = scalar_lea.vmem %s35_s8, 1024  ;;  %p1502_p12 = scmp.lt.s32.totalorder %s35_s8, %s35_s8 }
  0x1b   :  { %p1498_p11 = scmp.ne.s32.totalorder %s35_s8, %s1497_s16  ;;  %p1503_p13 = scmp.lt.s32.totalorder %s1497_s16, %s1497_s16 }
  0x1d   :  { %p1504_p0 = por %p1503_p13, %p1502_p12 }
  0x1f   :  { %p1505_p1 = pnand %p1504_p0, %p1498_p11 }
  0x21   :  { %1508 = shalt.err (!%p1505_p1)
}
  0x22   :  { %40 = dma.hbm_to_vmem [thread:$0]  %s1778_s3, 1024, %s35_s8, [#allocation8], %s1538_s28, %s1538_s28, %s1539_s29  }
  0x23   :  { %1531 = dma.done.wait [#allocation5], 5120  }
  0x24   :  { %1532 = vsyncadd [#allocation5], 4294962176 }
  0x25   :  { %1533 = dma.done.wait [#allocation8], 1024  }
  0x26   :  { %1534 = vsyncadd [#allocation8], 4294966272  ;;  %v1541_v0 = vmov 0   ;;  %v1542_v1 = vmov 0.0   ;;  %v1179_v2 = vld [vmem:[%s1776_s1 + $0x8] sm:$0xff]   ;;  %v1161_v3 = vld [vmem:[%s1776_s1] sm:$0xff]  }
  0x27   :  { %1380 = vset.pattern.permute.xlu1 %v1541_v0  ;;  %1368 = vset.pattern.permute.xlu0 %v1541_v0  ;;  %v1166_v4 = vunpack.c.l.bf16 %v1179_v2  ;;  %v1167_v5 = vunpack.c.h.bf16 %v1179_v2  ;;  %v1162_v6 = vunpack.c.l.bf16 %v1161_v3  ;;  %v1163_v7 = vunpack.c.h.bf16 %v1161_v3  ;;  %v1180_v8 = vld [vmem:[%s1776_s1 + $0x10] sm:$0xff]   ;;  %v1413_v11 = vld [vmem:[#allocation4 + $0x40] sm:$0xff]   ;;  %v1176_v12 = vld [vmem:[%s1775_s0 + $0x8] sm:$0xff]   ;;  %s1545_s14 = smov [#allocation9]  }
  0x28   :  { %1237 = vmatprep.subr.bf16.mxu0 %v1542_v1  ;;  %1257 = vmatprep.subr.bf16.mxu1 %v1542_v1  ;;  %v1181_v13 = vld [vmem:[%s1776_s1 + $0x18] sm:$0xff]   ;;  %v1170_v14 = vunpack.c.l.bf16 %v1180_v8  ;;  %v1171_v15 = vunpack.c.h.bf16 %v1180_v8  ;;  %v1414_v16 = vld [vmem:[#allocation4] sm:$0xff]   ;;  %v1415_v18 = vld [vmem:[#allocation4 + $0x48] sm:$0xff]   ;;  %v1543_v19 = vmov 1   ;;  %v1623_v20 = vunpack.c.l.bf16 %v1176_v12  ;;  %s1078_s15 = sshll.u32 %s1545_s14, 4  ;;  %s1079_s15 = int_to_ptr.vmem [resolvable:$true] %s1078_s15 }
  0x29   :  { %v1381_v9 = vpack.i.bf16 %v1167_v5, %v1166_v4  ;;  %v1369_v10 = vpack.i.bf16 %v1163_v7, %v1162_v6  ;;  %1238 = vmatpush3.bf16.msra.mxu0 %v1413_v11  ;;  %v1145_v17 = vld [vmem:[%s1775_s0] sm:$0xff]   ;;  %1258 = vmatpush3.bf16.msra.mxu1 %v1414_v16  ;;  %v1625_v21 = vunpack.c.h.bf16 %v1176_v12  ;;  %v1174_v23 = vunpack.c.l.bf16 %v1181_v13  ;;  %v1416_v25 = vld [vmem:[#allocation4 + $0x8] sm:$0xff]   ;;  %v1417_v30 = vld [vmem:[#allocation4 + $0x50] sm:$0xff]   ;;  %p1514_p3 = scmp.lt.s32.totalorder %s1079_s15, %s1079_s15 }
  0x2a   :  { %1239 = vmatprep.subr.bf16.mxu0 %v1542_v1  ;;  %v1398_v22 = vpack.i.bf16 %v1171_v15, %v1170_v14  ;;  %v1175_v24 = vunpack.c.h.bf16 %v1181_v13  ;;  %v190_v26 = vrot.slane %v1623_v20, 4  ;;  %v1629_v28 = vunpack.c.l.bf16 %v1145_v17  ;;  %1259 = vmatprep.subr.bf16.mxu1 %v1542_v1  ;;  %v1177_v41 = vld [vmem:[%s1775_s0 + $0x10] sm:$0xff]   ;;  %v1419_v50 = vld [vmem:[#allocation4 + $0x58] sm:$0xff]   ;;  %v1421_v60 = vld [vmem:[#allocation4 + $0x60] sm:$0xff]  }
  0x2b   :  { %1382 = vperm.xlu1 %1380, %v1381_v9   ;;  %1370 = vperm.xlu0 %1368, %v1369_v10   ;;  %v196_v27 = vrot.slane %v1625_v21, 4  ;;  %v1631_v29 = vunpack.c.h.bf16 %v1145_v17  ;;  %v1646_v43 = vunpack.c.l.bf16 %v1177_v41  ;;  %v1648_v46 = vunpack.c.h.bf16 %v1177_v41  ;;  %v1418_v47 = vld [vmem:[#allocation4 + $0x10] sm:$0xff]   ;;  %v1178_v51 = vld [vmem:[%s1775_s0 + $0x18] sm:$0xff]   ;;  %v1422_v5 = vld [vmem:[#allocation4 + $0x20] sm:$0xff]  }
  0x2c   :  { %v178_v31 = vrot.slane %v1629_v28, 4  ;;  %v1408_v33 = vpack.i.bf16 %v1175_v24, %v1174_v23  ;;  %v191_v36 = vadd.f32 %v1623_v20, %v190_v26  ;;  %v1654_v52 = vunpack.c.l.bf16 %v1178_v51  ;;  %v1420_v58 = vld [vmem:[#allocation4 + $0x18] sm:$0xff]   ;;  %v1424_v23 = vld [vmem:[#allocation4 + $0x28] sm:$0xff]  }
  0x2d   :  { %1240 = vmatpush3.bf16.msra.mxu0 %v1415_v18  ;;  %1260 = vmatpush3.bf16.msra.mxu1 %v1416_v25  ;;  %v184_v32 = vrot.slane %v1631_v29, 4  ;;  %v197_v39 = vadd.f32 %v1625_v21, %v196_v27  ;;  %v202_v49 = vrot.slane %v1646_v43, 4  ;;  %v1657_v54 = vunpack.c.h.bf16 %v1178_v51  ;;  %v1437_v51 = vld [vmem:[#allocation4 + $0xa0] sm:$0xff]  }
  0x2e   :  { %1241 = vmatprep.subr.bf16.mxu0 %v1542_v1  ;;  %1261 = vmatprep.subr.bf16.mxu1 %v1542_v1  ;;  %v179_v34 = vadd.f32 %v1629_v28, %v178_v31  ;;  %v192_v42 = vrot.slane %v191_v36, 2  ;;  %v208_v56 = vrot.slane %v1648_v46, 4  ;;  %v214_v59 = vrot.slane %v1654_v52, 4 }
  0x2f   :  { %1386 = vset.pattern.permute.xlu1 %v1543_v19  ;;  %1374 = vset.pattern.permute.xlu0 %v1543_v19  ;;  %v185_v35 = vadd.f32 %v1631_v29, %v184_v32  ;;  %v198_v44 = vrot.slane %v197_v39, 2  ;;  %v203_v53 = vadd.f32 %v1646_v43, %v202_v49  ;;  %v220_v62 = vrot.slane %v1657_v54, 4  ;;  %v1433_v49 = vld [vmem:[#allocation4 + $0x90] sm:$0xff]  }
  0x30   :  { %1388 = vperm.xlu1 %1386, %v1381_v9   ;;  %1376 = vperm.xlu0 %1374, %v1369_v10   ;;  %v180_v37 = vrot.slane %v179_v34, 2  ;;  %v193_v57 = vadd.f32 %v192_v42, %v191_v36  ;;  %v209_v61 = vadd.f32 %v1648_v46, %v208_v56  ;;  %vm234_vm0 = vcmask 1041409   ;;  %v1423_v9 = vld [vmem:[#allocation4 + $0x68] sm:$0xff]  }
  0x31   :  { %1242 = vmatpush3.bf16.msra.mxu0 %v1417_v30  ;;  %v186_v38 = vrot.slane %v185_v35, 2  ;;  %1262 = vmatpush3.bf16.msra.mxu1 %v1418_v47  ;;  %v204_v63 = vrot.slane %v203_v53, 2  ;;  %v199_v2 = vadd.f32 %v198_v44, %v197_v39  ;;  %v221_v4 = vadd.f32 %v1657_v54, %v220_v62  ;;  %v1425_v30 = vld [vmem:[#allocation4 + $0x70] sm:$0xff]   ;;  %v1428_v44 = vld [vmem:[#allocation4 + $0x38] sm:$0xff]   ;;  %v1429_v47 = vld [vmem:[#allocation4 + $0x80] sm:$0xff]  }
  0x32   :  { %1243 = vmatprep.subr.bf16.mxu0 %v1542_v1  ;;  %v181_v40 = vadd.f32 %v180_v37, %v179_v34  ;;  %1263 = vmatprep.subr.bf16.mxu1 %v1542_v1  ;;  %v210_v3 = vrot.slane %v209_v61, 2  ;;  %v194_v6 = vrot.slane %v193_v57, 1  ;;  %vm236_vm1 = vcmask 1042434   ;;  %v1426_v37 = vld [vmem:[#allocation4 + $0x30] sm:$0xff]  }
  0x33   :  { %v187_v45 = vadd.f32 %v186_v38, %v185_v35  ;;  %v205_v7 = vadd.f32 %v204_v63, %v203_v53  ;;  %v200_v12 = vrot.slane %v199_v2, 1  ;;  %v222_v17 = vrot.slane %v221_v4, 2  ;;  %v1439_v53 = vld [vmem:[#allocation4 + $0xa8] sm:$0xff]  }
  0x34   :  { %1392 = vset.pattern.permute.xlu1 %v1541_v0  ;;  %1399 = vperm.xlu0 %1374, %v1398_v22   ;;  %v182_v48 = vrot.slane %v181_v40, 1  ;;  %v215_v0 = vadd.f32 %v1654_v52, %v214_v59  ;;  %v211_v13 = vadd.f32 %v210_v3, %v209_v61  ;;  %v195_v14 = vadd.f32 %v194_v6, %v193_v57 }
  0x35   :  { %1394 = vperm.xlu1 %1392, %v1398_v22   ;;  %1244 = vmatpush3.bf16.msra.mxu0 %v1419_v50  ;;  %v188_v55 = vrot.slane %v187_v45, 1  ;;  %v206_v15 = vrot.slane %v205_v7, 1  ;;  %v201_v18 = vadd.f32 %v200_v12, %v199_v2  ;;  %vm238_vm2 = vcmask 1043459   ;;  %v1435_v50 = vld [vmem:[#allocation4 + $0x98] sm:$0xff]  }
  0x36   :  { %1245 = vmatprep.subr.bf16.mxu0 %v1542_v1  ;;  %1264 = vmatpush3.bf16.msra.mxu1 %v1420_v58  ;;  %v216_v8 = vrot.slane %v215_v0, 2  ;;  %v183_v10 = vadd.f32 %v182_v48, %v181_v40  ;;  %v212_v19 = vrot.slane %v211_v13, 1  ;;  %v223_v26 = vadd.f32 %v222_v17, %v221_v4  ;;  %v1427_v40 = vld [vmem:[#allocation4 + $0x78] sm:$0xff]   ;;  %v1431_v48 = vld [vmem:[#allocation4 + $0x88] sm:$0xff]  }
  0x37   :  { %1265 = vmatprep.subr.bf16.mxu1 %v1542_v1  ;;  %v189_v11 = vadd.f32 %v188_v55, %v187_v45  ;;  %v207_v24 = vadd.f32 %v206_v15, %v205_v7  ;;  %vm240_vm3 = vcmask 1044484   ;;  %vm242_vm4 = vcmask 1045509   ;;  %v1441_v55 = vld [vmem:[#allocation4 + $0xb0] sm:$0xff]  }
  0x38   :  { %1409 = vperm.xlu0 %1374, %v1408_v33   ;;  %v217_v16 = vadd.f32 %v216_v8, %v215_v0  ;;  %v213_v31 = vadd.f32 %v212_v19, %v211_v13  ;;  %v224_v34 = vrot.slane %v223_v26, 1  ;;  %vm244_vm5 = vcmask 1046534  }
  0x39   :  { %1404 = vperm.xlu1 %1392, %v1408_v33   ;;  %1246 = vmatpush3.bf16.msra.mxu0 %v1421_v60  ;;  %v235_v22 = vsel %vm234_vm0, %v189_v11, %v183_v10  ;;  %vm246_vm6 = vcmask 1047559   ;;  %vm1544_vm7 = vmmov 0  }
  0x3a   :  { %1247 = vmatprep.subr.bf16.mxu0 %v1542_v1  ;;  %1266 = vmatpush3.bf16.msra.mxu1 %v1422_v5  ;;  %v218_v25 = vrot.slane %v217_v16, 1  ;;  %v237_v27 = vsel %vm236_vm1, %v195_v14, %v235_v22  ;;  %v225_v38 = vadd.f32 %v224_v34, %v223_v26 }
  0x3b   :  { %1267 = vmatprep.subr.bf16.mxu1 %v1542_v1  ;;  %v239_v32 = vsel %vm238_vm2, %v201_v18, %v237_v27  ;;  %1253 = vmatprep.mubr.msk.bf16.mxu0 %vm1544_vm7, %v1542_v1 }
  0x3c   :  { %v219_v33 = vadd.f32 %v218_v25, %v217_v16  ;;  %v241_v35 = vsel %vm240_vm3, %v207_v24, %v239_v32  ;;  %1273 = vmatprep.mubr.msk.bf16.mxu1 %vm1544_vm7, %v1542_v1 }
  0x3d   :  { %1248 = vmatpush3.bf16.msra.mxu0 %v1423_v9  ;;  %v243_v36 = vsel %vm242_vm4, %v213_v31, %v241_v35 }
  0x3e   :  { %1249 = vmatprep.subr.bf16.mxu0 %v1542_v1  ;;  %1268 = vmatpush3.bf16.msra.mxu1 %v1424_v23  ;;  %v245_v39 = vsel %vm244_vm5, %v219_v33, %v243_v36 }
  0x3f   :  { %1269 = vmatprep.subr.bf16.mxu1 %v1542_v1  ;;  %v247_v41 = vsel %vm246_vm6, %v225_v38, %v245_v39 }
  0x40   :  { %v390_v42 = vmul.f32 0.125, %v247_v41 }
  0x41   :  { %1250 = vmatpush3.bf16.msra.mxu0 %v1425_v30 }
  0x42   :  { %1251 = vmatprep.subr.bf16.mxu0 %v1542_v1  ;;  %1270 = vmatpush3.bf16.msra.mxu1 %v1426_v37  ;;  %v391_v45 = vpack.c.bf16 %v390_v42, %v390_v42 }
  0x43   :  { %1271 = vmatprep.subr.bf16.mxu1 %v1542_v1 }
  0x45   :  { %1252 = vmatpush3.bf16.msra.mxu0 %v1427_v40 }
  0x46   :  { %1277 = vmatprep.subr.bf16.mxu0 %v1542_v1  ;;  %1272 = vmatpush3.bf16.msra.mxu1 %v1428_v44 }
  0x47   :  { %1297 = vmatprep.subr.bf16.mxu1 %v1542_v1 }
  0x48   :  { %1254 = vmatmul.mubr.bf16.vlgmr.msra.gmra.mrb[0].mxu0 %v391_v45 }
  0x49   :  { %1293 = vmatprep.mubr.msk.bf16.mxu0 %vm1544_vm7, %v1542_v1  ;;  %1278 = vmatpush3.bf16.msra.mxu0 %v1429_v47 }
  0x4a   :  { %1279 = vmatprep.subr.bf16.mxu0 %v1542_v1 }
  0x4d   :  { %1280 = vmatpush3.bf16.msra.mxu0 %v1431_v48 }
  0x4e   :  { %1281 = vmatprep.subr.bf16.mxu0 %v1542_v1 }
  0x51   :  { %1282 = vmatpush3.bf16.msra.mxu0 %v1433_v49 }
  0x52   :  { %1283 = vmatprep.subr.bf16.mxu0 %v1542_v1 }
  0x55   :  { %1284 = vmatpush3.bf16.msra.mxu0 %v1435_v50 }
  0x56   :  { %1285 = vmatprep.subr.bf16.mxu0 %v1542_v1 }
  0x59   :  { %1286 = vmatpush3.bf16.msra.mxu0 %v1437_v51 }
  0x5a   :  { %1287 = vmatprep.subr.bf16.mxu0 %v1542_v1 }
  0x5d   :  { %1288 = vmatpush3.bf16.msra.mxu0 %v1439_v53 }
  0x5e   :  { %1289 = vmatprep.subr.bf16.mxu0 %v1542_v1 }
  0x61   :  { %1290 = vmatpush3.bf16.msra.mxu0 %v1441_v55 }
  0x62   :  { %1291 = vmatprep.subr.bf16.mxu0 %v1542_v1 }
  0xaa   :  { %v1383_v56 = vpop.permute.xlu1 %1382  ;;  %v1371_v57 = vpop.permute.xlu0 %1370 }
  0xab   :  { %v1385_v58 = vunpack.i.h.bf16 %v1383_v56  ;;  %v1384_v59 = vunpack.i.l.bf16 %v1383_v56  ;;  %v1373_v60 = vunpack.i.h.bf16 %v1371_v57  ;;  %v1372_v61 = vunpack.i.l.bf16 %v1371_v57 }
  0xad   :  { %v131_v62 = vmul.f32 %v1384_v59, %v1623_v20  ;;  %v132_v63 = vmul.f32 %v1385_v58, %v1625_v21  ;;  %v129_v0 = vmul.f32 %v1372_v61, %v1629_v28  ;;  %v130_v2 = vmul.f32 %v1373_v60, %v1631_v29 }
  0xaf   :  { %v264_v3 = vrot.slane %v131_v62, 4  ;;  %v270_v4 = vrot.slane %v132_v63, 4  ;;  %v252_v5 = vrot.slane %v129_v0, 4  ;;  %v258_v6 = vrot.slane %v130_v2, 4  ;;  %v1389_v7 = vpop.permute.xlu1 %1388  ;;  %v1377_v8 = vpop.permute.xlu0 %1376 }
  0xb0   :  { %v1391_v9 = vunpack.i.h.bf16 %v1389_v7  ;;  %v1390_v10 = vunpack.i.l.bf16 %v1389_v7  ;;  %v1379_v11 = vunpack.i.h.bf16 %v1377_v8  ;;  %v1378_v12 = vunpack.i.l.bf16 %v1377_v8 }
  0xb1   :  { %v265_v13 = vmax.f32 %v131_v62, %v264_v3  ;;  %v271_v14 = vmax.f32 %v132_v63, %v270_v4  ;;  %v253_v15 = vmax.f32 %v129_v0, %v252_v5  ;;  %v259_v16 = vmax.f32 %v130_v2, %v258_v6 }
  0xb2   :  { %v171_v17 = vmul.f32 %v1390_v10, %v1623_v20  ;;  %v172_v18 = vmul.f32 %v1391_v9, %v1625_v21  ;;  %v169_v19 = vmul.f32 %v1378_v12, %v1629_v28  ;;  %v170_v22 = vmul.f32 %v1379_v11, %v1631_v29 }
  0xb3   :  { %v266_v23 = vrot.slane %v265_v13, 2  ;;  %v272_v24 = vrot.slane %v271_v14, 2  ;;  %v254_v25 = vrot.slane %v253_v15, 2  ;;  %v260_v26 = vrot.slane %v259_v16, 2  ;;  %v1400_v41 = vpop.permute.xlu0 %1399 }
  0xb4   :  { %v332_v27 = vrot.slane %v171_v17, 4  ;;  %v338_v30 = vrot.slane %v172_v18, 4  ;;  %v320_v31 = vrot.slane %v169_v19, 4  ;;  %v326_v32 = vrot.slane %v170_v22, 4  ;;  %v1395_v42 = vpop.permute.xlu1 %1394 }
  0xb5   :  { %v267_v33 = vmax.f32 %v265_v13, %v266_v23  ;;  %v273_v34 = vmax.f32 %v271_v14, %v272_v24  ;;  %v255_v35 = vmax.f32 %v253_v15, %v254_v25  ;;  %v261_v36 = vmax.f32 %v259_v16, %v260_v26 }
  0xb6   :  { %v333_v37 = vmax.f32 %v171_v17, %v332_v27  ;;  %v339_v20 = vmax.f32 %v172_v18, %v338_v30  ;;  %v321_v38 = vmax.f32 %v169_v19, %v320_v31  ;;  %v327_v21 = vmax.f32 %v170_v22, %v326_v32 }
  0xb7   :  { %v268_v39 = vrot.slane %v267_v33, 1  ;;  %v274_v28 = vrot.slane %v273_v34, 1  ;;  %v256_v40 = vrot.slane %v255_v35, 1  ;;  %v262_v29 = vrot.slane %v261_v36, 1  ;;  %v1410_v6 = vpop.permute.xlu0 %1409 }
  0xb8   :  { %v334_v44 = vrot.slane %v333_v37, 2  ;;  %v340_v45 = vrot.slane %v339_v20, 2  ;;  %v322_v47 = vrot.slane %v321_v38, 2  ;;  %v328_v48 = vrot.slane %v327_v21, 2  ;;  %v1405_v7 = vpop.permute.xlu1 %1404 }
  0xb9   :  { %v257_v49 = vmax.f32 %v255_v35, %v256_v40  ;;  %v263_v50 = vmax.f32 %v261_v36, %v262_v29  ;;  %v1704_v57 = vmax.f32 %v267_v33, %v268_v39  ;;  %v1402_v58 = vunpack.i.h.bf16 %v1400_v41 }
  0xba   :  { %v335_v51 = vmax.f32 %v333_v37, %v334_v44  ;;  %v341_v53 = vmax.f32 %v339_v20, %v340_v45  ;;  %v323_v55 = vmax.f32 %v321_v38, %v322_v47  ;;  %v329_v56 = vmax.f32 %v327_v21, %v328_v48 }
  0xbb   :  { %v1401_v59 = vunpack.i.l.bf16 %v1400_v41  ;;  %v1397_v60 = vunpack.i.h.bf16 %v1395_v42  ;;  %v1706_v61 = vmax.f32 %v273_v34, %v274_v28  ;;  %v174_v3 = vmul.f32 %v1402_v58, %v1648_v46 }
  0xbc   :  { %v336_v62 = vrot.slane %v335_v51, 1  ;;  %v324_v63 = vrot.slane %v323_v55, 1  ;;  %v330_v0 = vrot.slane %v329_v56, 1  ;;  %v1396_v4 = vunpack.i.l.bf16 %v1395_v42 }
  0xbd   :  { %v173_v2 = vmul.f32 %v1401_v59, %v1646_v43  ;;  %v134_v5 = vmul.f32 %v1397_v60, %v1648_v46  ;;  %v308_v8 = vsel %vm234_vm0, %v263_v50, %v257_v49  ;;  %v342_v10 = vrot.slane %v341_v53, 1 }
  0xbe   :  { %v337_v9 = vmax.f32 %v335_v51, %v336_v62  ;;  %v325_v11 = vmax.f32 %v323_v55, %v324_v63  ;;  %v350_v13 = vrot.slane %v174_v3, 4  ;;  %v133_v14 = vmul.f32 %v1396_v4, %v1646_v43 }
  0xbf   :  { %v344_v12 = vrot.slane %v173_v2, 4  ;;  %v282_v15 = vrot.slane %v134_v5, 4  ;;  %v331_v16 = vmax.f32 %v329_v56, %v330_v0  ;;  %v1412_v17 = vunpack.i.h.bf16 %v1410_v6 }
  0xc0   :  { %v1411_v18 = vunpack.i.l.bf16 %v1410_v6  ;;  %v1407_v19 = vunpack.i.h.bf16 %v1405_v7  ;;  %v351_v23 = vmax.f32 %v174_v3, %v350_v13  ;;  %v276_v24 = vrot.slane %v133_v14, 4 }
  0xc1   :  { %v345_v22 = vmax.f32 %v173_v2, %v344_v12  ;;  %v283_v46 = vmax.f32 %v134_v5, %v282_v15  ;;  %v176_v26 = vmul.f32 %v1412_v17, %v1657_v54  ;;  %v1406_v27 = vunpack.i.l.bf16 %v1405_v7 }
  0xc2   :  { %v175_v25 = vmul.f32 %v1411_v18, %v1654_v52  ;;  %v136_v30 = vmul.f32 %v1407_v19, %v1657_v54  ;;  %v352_v32 = vrot.slane %v351_v23, 2  ;;  %v277_v33 = vmax.f32 %v133_v14, %v276_v24  ;;  %v1430_v24 = vld [vmem:[#allocation4 + $0x100] sm:$0xff]  }
  0xc3   :  { %v346_v31 = vrot.slane %v345_v22, 2  ;;  %v284_v43 = vrot.slane %v283_v46, 2  ;;  %v362_v35 = vrot.slane %v176_v26, 4  ;;  %v135_v36 = vmul.f32 %v1406_v27, %v1654_v52  ;;  %v1438_v27 = vld [vmem:[#allocation4 + $0x120] sm:$0xff]  }
  0xc4   :  { %v356_v34 = vrot.slane %v175_v25, 4  ;;  %v294_v37 = vrot.slane %v136_v30, 4  ;;  %v353_v38 = vmax.f32 %v351_v23, %v352_v32  ;;  %v278_v21 = vrot.slane %v277_v33, 2 }
  0xc5   :  { %v347_v20 = vmax.f32 %v345_v22, %v346_v31  ;;  %v285_v39 = vmax.f32 %v283_v46, %v284_v43  ;;  %v363_v40 = vmax.f32 %v176_v26, %v362_v35  ;;  %v288_v29 = vrot.slane %v135_v36, 4  ;;  %v1432_v46 = vld [vmem:[#allocation4 + $0x108] sm:$0xff]   ;;  %v1436_v26 = vld [vmem:[#allocation4 + $0x118] sm:$0xff]  }
  0xc6   :  { %v357_v28 = vmax.f32 %v175_v25, %v356_v34  ;;  %v295_v41 = vmax.f32 %v136_v30, %v294_v37  ;;  %v376_v42 = vsel %vm234_vm0, %v331_v16, %v325_v11  ;;  %v354_v44 = vrot.slane %v353_v38, 1  ;;  %v1434_v25 = vld [vmem:[#allocation4 + $0x110] sm:$0xff]   ;;  %v1440_v30 = vld [vmem:[#allocation4 + $0x128] sm:$0xff]   ;;  %v1443_v35 = vld [vmem:[#allocation4 + $0xb8] sm:$0xff]  }
  0xc7   :  { %v348_v54 = vrot.slane %v347_v20, 1  ;;  %v279_v45 = vmax.f32 %v277_v33, %v278_v21  ;;  %v364_v48 = vrot.slane %v363_v40, 2  ;;  %v289_v49 = vmax.f32 %v135_v36, %v288_v29  ;;  %v1442_v34 = vld [vmem:[#allocation4 + $0x130] sm:$0xff]   ;;  %1292 = vmatpush3.bf16.msra.mxu0 %v1443_v35  ;;  %v1444_v36 = vld [vmem:[#allocation4 + $0x138] sm:$0xff]   ;;  %v1091_v37 = vld [vmem:[%s1779_s4] ss:$0 sm:$0xff] }
  0xc8   :  { %v358_v47 = vrot.slane %v357_v28, 2  ;;  %v296_v50 = vrot.slane %v295_v41, 2  ;;  %v343_v51 = vmax.f32 %v341_v53, %v342_v10  ;;  %v286_v56 = vrot.slane %v285_v39, 1  ;;  %1317 = vmatprep.subr.bf16.mxu0 %v1542_v1 }
  0xc9   :  { %v349_v52 = vmax.f32 %v347_v20, %v348_v54  ;;  %v280_v55 = vrot.slane %v279_v45, 1  ;;  %v365_v59 = vmax.f32 %v363_v40, %v364_v48  ;;  %v290_v60 = vrot.slane %v289_v49, 2  ;;  %v1449_v48 = vld [vmem:[#allocation4 + $0xe0] sm:$0xff]  }
  0xca   :  { %v359_v58 = vmax.f32 %v357_v28, %v358_v47  ;;  %v297_v62 = vmax.f32 %v295_v41, %v296_v50  ;;  %v355_v63 = vmax.f32 %v353_v38, %v354_v44  ;;  %v309_v2 = vsel %vm236_vm1, %v1704_v57, %v308_v8  ;;  %v1445_v41 = vld [vmem:[#allocation4 + $0xc0] sm:$0xff]   ;;  %v1446_v44 = vld [vmem:[#allocation4 + $0xc8] sm:$0xff]   ;;  %v1448_v47 = vld [vmem:[#allocation4 + $0xd8] sm:$0xff]  }
  0xcb   :  { %v281_v0 = vmax.f32 %v279_v45, %v280_v55  ;;  %v377_v3 = vsel %vm236_vm1, %v337_v9, %v376_v42  ;;  %v366_v5 = vrot.slane %v365_v59, 1  ;;  %v291_v6 = vmax.f32 %v289_v49, %v290_v60  ;;  %v1447_v45 = vld [vmem:[#allocation4 + $0xd0] sm:$0xff]   ;;  %v1450_v49 = vld [vmem:[#allocation4 + $0xe8] sm:$0xff]  }
  0xcc   :  { %v360_v4 = vrot.slane %v359_v58, 1  ;;  %v298_v7 = vrot.slane %v297_v62, 1  ;;  %v287_v11 = vmax.f32 %v285_v39, %v286_v56  ;;  %v378_v53 = vsel %vm238_vm2, %v343_v51, %v377_v3  ;;  %v1451_v50 = vld [vmem:[#allocation4 + $0xf0] sm:$0xff]   ;;  %v1452_v51 = vld [vmem:[#allocation4 + $0xf8] sm:$0xff]   ;;  %v1454_v55 = vld [vmem:[#allocation7 + $0x8] sm:$0xff]  }
  0xcd   :  { %v367_v12 = vmax.f32 %v365_v59, %v366_v5  ;;  %v292_v13 = vrot.slane %v291_v6, 1  ;;  %v310_v14 = vsel %vm238_vm2, %v1706_v61, %v309_v2  ;;  %v379_v57 = vsel %vm240_vm3, %v349_v52, %v378_v53  ;;  %v1453_v52 = vld [vmem:[#allocation7] sm:$0xff]   ;;  %v1455_v56 = vld [vmem:[#allocation7 + $0x10] sm:$0xff]   ;;  %v1458_v60 = vld [vmem:[#allocation7 + $0x28] sm:$0xff]  }
  0xce   :  { %v361_v10 = vmax.f32 %v359_v58, %v360_v4  ;;  %v299_v15 = vmax.f32 %v297_v62, %v298_v7  ;;  %v311_v16 = vsel %vm240_vm3, %v281_v0, %v310_v14  ;;  %v380_v9 = vsel %vm242_vm4, %v355_v63, %v379_v57  ;;  %v1456_v58 = vld [vmem:[#allocation7 + $0x18] sm:$0xff]   ;;  %v1457_v59 = vld [vmem:[#allocation7 + $0x20] sm:$0xff]  }
  0xcf   :  { %v293_v8 = vmax.f32 %v291_v6, %v292_v13  ;;  %v312_v17 = vsel %vm242_vm4, %v287_v11, %v311_v16  ;;  %v1460_v62 = vld [vmem:[#allocation7 + $0x38] sm:$0xff]   ;;  %v1108_v63 = vld [vmem:[%s1779_s4 + $0x1] ss:$0 sm:$0xff]  ;;  %v1133_v14 = vld [vmem:[%s1779_s4 + $0x2] ss:$0 sm:$0xff] }
  0xd0   :  { %v381_v18 = vsel %vm244_vm5, %v361_v10, %v380_v9 }
  0xd1   :  { %v313_v19 = vsel %vm244_vm5, %v293_v8, %v312_v17  ;;  %v382_v22 = vsel %vm246_vm6, %v367_v12, %v381_v18  ;;  %v1134_v18 = vld [vmem:[%s1779_s4 + $0x3] ss:$0 sm:$0xff]  ;;  %s1509_s4 = scalar_lea.vmem %s1079_s15, 384 }
  0xd2   :  { %v314_v23 = vsel %vm246_vm6, %v299_v15, %v313_v19  ;;  %p1510_p2 = scmp.ne.s32.totalorder %s1079_s15, %s1509_s4  ;;  %p1515_p4 = scmp.lt.s32.totalorder %s1509_s4, %s1509_s4 }
  0xd3   :  { %v394_v61 = vpack.c.bf16 %v382_v22, %v314_v23 }
  0xd4   :  { %p1516_p5 = por %p1515_p4, %p1514_p3 }
  0xd5   :  { %1274 = vmatmul.mubr.bf16.vlgmr.msra.gmra.mrb[0].mxu1 %v394_v61 }
  0xd6   :  { %1298 = vmatpush3.bf16.msra.mxu1 %v1430_v24  ;;  %1313 = vmatprep.mubr.msk.bf16.mxu1 %vm1544_vm7, %v1542_v1  ;;  %p1517_p6 = pnand %p1516_p5, %p1510_p2 }
  0xd7   :  { %1299 = vmatprep.subr.bf16.mxu1 %v1542_v1 }
  0xda   :  { %1300 = vmatpush3.bf16.msra.mxu1 %v1432_v46 }
  0xdb   :  { %1301 = vmatprep.subr.bf16.mxu1 %v1542_v1 }
  0xde   :  { %1302 = vmatpush3.bf16.msra.mxu1 %v1434_v25 }
  0xdf   :  { %1303 = vmatprep.subr.bf16.mxu1 %v1542_v1 }
  0xe2   :  { %1304 = vmatpush3.bf16.msra.mxu1 %v1436_v26 }
  0xe3   :  { %1305 = vmatprep.subr.bf16.mxu1 %v1542_v1 }
  0xe6   :  { %1306 = vmatpush3.bf16.msra.mxu1 %v1438_v27 }
  0xe7   :  { %1307 = vmatprep.subr.bf16.mxu1 %v1542_v1 }
  0xea   :  { %1308 = vmatpush3.bf16.msra.mxu1 %v1440_v30 }
  0xeb   :  { %1309 = vmatprep.subr.bf16.mxu1 %v1542_v1 }
  0xee   :  { %1310 = vmatpush3.bf16.msra.mxu1 %v1442_v34 }
  0xef   :  { %1311 = vmatprep.subr.bf16.mxu1 %v1542_v1 }
  0xf2   :  { %1312 = vmatpush3.bf16.msra.mxu1 %v1444_v36 }
  0xf3   :  { %1337 = vmatprep.subr.bf16.mxu1 %v1453_v52 }
 0x11b   :  { %v499_v31 = vpop.f32.mrb[0].mxu0 }
 0x11c   :  { %v1255_v32 = vpop.f32.mrb[1].mxu0  ;;  %v500_v20 = vadd.f32 %v1091_v37, %v499_v31 }
 0x11d   :  { %v502_v33 = vpop.f32.mrb[2].mxu0 }
 0x11e   :  { %v1256_v43 = vpop.f32.mrb[3].mxu0 }
 0x1a8   :  { %v603_v38 = vpop.f32.mrb[0].mxu1 }
 0x1a9   :  { %v610_v21 = vadd.f32 %v603_v38, %v500_v20  ;;  %v1275_v39 = vpop.f32.mrb[1].mxu1 }
 0x1aa   :  { %v606_v28 = vpop.f32.mrb[2].mxu1 }
 0x1ab   :  { %v611_v40 = vadd.f32 %v606_v28, %v500_v20  ;;  %v1276_v29 = vpop.f32.mrb[3].mxu1 }
 0x1ad   :  { %v612_v42 = vpack.c.bf16 %v611_v40, %v610_v21 }
 0x1af   :  { %v759_v54 = vrot.slane %v612_v42, 4  ;;  %1294 = vmatmul.mubr.bf16.vlgmr.msra.gmra.mrb[4].mxu0 %v612_v42 }
 0x1b0   :  { %1318 = vmatpush3.bf16.msra.mxu0 %v1445_v41  ;;  %1333 = vmatprep.mubr.msk.bf16.mxu0 %vm1544_vm7, %v1542_v1 }
 0x1b1   :  { %1314 = vmatmul.mubr.bf16.vlgmr.msra.gmra.mrb[4].mxu1 %v759_v54  ;;  %1319 = vmatprep.subr.bf16.mxu0 %v1542_v1 }
 0x1b2   :  { %1338 = vmatpush3.bf16.msra.mxu1 %v1453_v52 }
 0x1b3   :  { %1339 = vmatprep.subr.bf16.mxu1 %v1454_v55 }
 0x1b4   :  { %1320 = vmatpush3.bf16.msra.mxu0 %v1446_v44 }
 0x1b5   :  { %1321 = vmatprep.subr.bf16.mxu0 %v1542_v1 }
 0x1b6   :  { %1340 = vmatpush3.bf16.msra.mxu1 %v1454_v55 }
 0x1b7   :  { %1341 = vmatprep.subr.bf16.mxu1 %v1455_v56 }
 0x1b8   :  { %1322 = vmatpush3.bf16.msra.mxu0 %v1447_v45 }
 0x1b9   :  { %1323 = vmatprep.subr.bf16.mxu0 %v1542_v1 }
 0x1ba   :  { %1342 = vmatpush3.bf16.msra.mxu1 %v1455_v56 }
 0x1bb   :  { %1343 = vmatprep.subr.bf16.mxu1 %v1456_v58 }
 0x1bc   :  { %1324 = vmatpush3.bf16.msra.mxu0 %v1448_v47 }
 0x1bd   :  { %1325 = vmatprep.subr.bf16.mxu0 %v1542_v1 }
 0x1be   :  { %1344 = vmatpush3.bf16.msra.mxu1 %v1456_v58 }
 0x1bf   :  { %1345 = vmatprep.subr.bf16.mxu1 %v1457_v59 }
 0x1c0   :  { %1326 = vmatpush3.bf16.msra.mxu0 %v1449_v48 }
 0x1c1   :  { %1327 = vmatprep.subr.bf16.mxu0 %v1542_v1 }
 0x1c2   :  { %1346 = vmatpush3.bf16.msra.mxu1 %v1457_v59 }
 0x1c3   :  { %1347 = vmatprep.subr.bf16.mxu1 %v1458_v60 }
 0x1c4   :  { %1328 = vmatpush3.bf16.msra.mxu0 %v1450_v49 }
 0x1c5   :  { %1329 = vmatprep.subr.bf16.mxu0 %v1542_v1 }
 0x1c6   :  { %1348 = vmatpush3.bf16.msra.mxu1 %v1458_v60 }
 0x1c8   :  { %1330 = vmatpush3.bf16.msra.mxu0 %v1451_v50 }
 0x1c9   :  { %1331 = vmatprep.subr.bf16.mxu0 %v1542_v1  ;;  %v1459_v1 = vld [vmem:[#allocation7 + $0x30] sm:$0xff]  }
 0x1ca   :  { %1349 = vmatprep.subr.bf16.mxu1 %v1459_v1 }
 0x1cb   :  { %1350 = vmatpush3.bf16.msra.mxu1 %v1459_v1 }
 0x1cc   :  { %1332 = vmatpush3.bf16.msra.mxu0 %v1452_v51  ;;  %1351 = vmatprep.subr.bf16.mxu1 %v1460_v62 }
 0x1cf   :  { %1334 = vmatmul.mubr.bf16.vlgmr.msra.gmra.mrb[8].mxu0 %v612_v42  ;;  %1352 = vmatpush3.bf16.msra.mxu1 %v1460_v62 }
 0x282   :  { %v717_v0 = vpop.f32.mrb[4].mxu0 }
 0x283   :  { %v1295_v2 = vpop.f32.mrb[5].mxu0  ;;  %v718_v5 = vadd.f32 %v1108_v63, %v717_v0 }
 0x284   :  { %v720_v3 = vpop.f32.mrb[6].mxu0  ;;  %v843_v4 = vpop.f32.mrb[4].mxu1 }
 0x285   :  { %v721_v6 = vadd.f32 %v1108_v63, %v720_v3  ;;  %v1296_v7 = vpop.f32.mrb[7].mxu0  ;;  %v1315_v11 = vpop.f32.mrb[5].mxu1 }
 0x286   :  { %v846_v53 = vpop.f32.mrb[6].mxu1 }
 0x287   :  { %v943_v10 = vpack.c.bf16 %v721_v6, %v718_v5  ;;  %v1316_v12 = vpop.f32.mrb[7].mxu1 }
 0x289   :  { %1353 = vmatprep.mubr.bf16.mxu1 %v943_v10 }
 0x2a2   :  { %v931_v13 = vpop.f32.mrb[8].mxu0 }
 0x2a3   :  { %v932_v15 = vadd.f32 %v931_v13, %v843_v4  ;;  %v1335_v16 = vpop.f32.mrb[9].mxu0 }
 0x2a4   :  { %v934_v57 = vpop.f32.mrb[10].mxu0 }
 0x2a5   :  { %v942_v8 = vadd.f32 %v1133_v14, %v932_v15  ;;  %v1336_v9 = vpop.f32.mrb[11].mxu0 }
 0x2a7   :  { %v944_v17 = vpack.c.bf16 %v942_v8, %v942_v8 }
 0x2a9   :  { %1354 = vmatmul.mubr.bf16.vlgmr.msra.gmra.mrb[8].mxu1 %v944_v17 }
 0x37c   :  { %v1355_v19 = vpop.f32.mrb[8].mxu1 }
 0x37d   :  { %v1057_v22 = vadd.f32 %v1355_v19, %v1134_v18  ;;  %v1048_v23 = vpop.f32.mrb[9].mxu1 }
 0x37e   :  { %v1049_v24 = vadd.f32 %v1134_v18, %v1048_v23  ;;  %v1356_v61 = vpop.f32.mrb[10].mxu1 }
 0x37f   :  { %v1143_v46 = vmul.f32 -1.442695, %v1057_v22  ;;  %v1051_v25 = vpop.f32.mrb[11].mxu1 }
 0x380   :  { %1062 = vst [vmem:[#allocation9] sm:$0xff] %v1049_v24  ;;  %v1052_v26 = vadd.f32 %v1134_v18, %v1051_v25 }
 0x381   :  { %1461 = vpow2.f32 %v1143_v46 }
 0x382   :  { %1064 = vst [vmem:[#allocation9 + $0x8] sm:$0xff] %v1052_v26 }
 0x38b   :  { %v1462_v27 = vpop.eup %1461 }
 0x38c   :  { %v1068_v30 = vadd.f32 1.0, %v1462_v27 }
 0x38e   :  { %1463 = vrcp.f32 %v1068_v30 }
 0x398   :  { %v1464_v31 = vpop.eup %1463 }
 0x399   :  { %1072 = vst [vmem:[#allocation9 + $0x10] sm:$0xff] %v1464_v31 }
 0x39a   :  { %1520 = shalt.err (!%p1517_p6)
}
 0x39b   :  { %s1521_s17 = scalar_lea.hbm %s1780_s5, 384 }
 0x39c   :  { %p1522_p7 = scmp.ne.s32.totalorder %s1780_s5, %s1521_s17  ;;  %p1525_p8 = scmp.lt.u32.totalorder %s1521_s17, %s1780_s5 }
 0x39e   :  { %p1527_p9 = pnand %p1525_p8, %p1522_p7 }
 0x3a0   :  { %1530 = shalt.err (!%p1527_p9)
}
 0x3a1   :  { %s1546_s3 = smov 128   ;;  %s1547_s22 = smov 8  }
 0x3a2   :  { %1084 = dma.vmem_to_hbm [thread:$0]  %s1079_s15, 384, %s1780_s5, [#allocation6], %s1546_s3, %s1546_s3, %s1547_s22  }
 0x3a3   :  { %1535 = dma.done.wait [#allocation6], 384  }
 0x3a4   :  { %1536 = vsyncadd [#allocation6], 4294966912 }
 0x3a5   :  { %1088 = vsyncpa [#allocation5], 1 }
 0x3a6   :  { %1089 = vsyncpa [#allocation8], 1 }
 0x3a7   :  { %1090 = vsyncpa [#allocation6], 1 }

</bundles_post_ra>
